<compile_context>
chip_gen: v6e
topology: v6e:2x2x1
jax: 0.10.0
libtpu: 0.0.40
codegen_flags: <defaults>
</compile_context>

<pallas_src>
import jax
import jax.numpy as jnp
from jax.experimental import pallas as pl
from jax.experimental.pallas import tpu as pltpu


EEG_DIM = 32
FACE_DIM = 768
HIDDEN_DIM = 128
OUTPUT_DIM = 2
OUT_PAD = 8          # lane-padded logits width (sliced back to OUTPUT_DIM outside)


def _round_up(x, m):
    return (x + m - 1) // m * m


# -----------------------------------------------------------------------------
# Kernel: one batch tile per grid step; all weights resident in VMEM.
#   eeg  : (TB, 32)   f32 (cast to bf16 in-kernel)
#   face : (TB, 768)  f32 (cast to bf16 in-kernel)
#   w*   : bf16 weights, (in, out) layout; b* : (1, out) f32 biases
#   out  : (TB, 8) f32 (cols >= OUTPUT_DIM are exact zero pad)
# -----------------------------------------------------------------------------
def _fused_mlp_kernel(
    eeg_ref, face_ref,
    w1e_ref, b1e_ref, w2e_ref, b2e_ref,
    w1f_ref, b1f_ref, w2f_ref, b2f_ref,
    wf1e_ref, wf1f_ref, bf1_ref,
    wf2_ref, bf2_ref,
    out_ref,
):
    bf16 = jnp.bfloat16
    f32 = jnp.float32
    relu = lambda x: jnp.maximum(x, 0.0)

    # EEG encoder: Linear(32,128)+ReLU, [Dropout -> eval no-op], Linear(128,128)+ReLU
    he = relu(jnp.dot(eeg_ref[...].astype(bf16), w1e_ref[...],
                      preferred_element_type=f32) + b1e_ref[...])
    he = relu(jnp.dot(he.astype(bf16), w2e_ref[...],
                      preferred_element_type=f32) + b2e_ref[...])

    # Face encoder: Linear(768,128)+ReLU, [Dropout -> eval no-op], Linear(128,128)+ReLU
    hf = relu(jnp.dot(face_ref[...].astype(bf16), w1f_ref[...],
                      preferred_element_type=f32) + b1f_ref[...])
    hf = relu(jnp.dot(hf.astype(bf16), w2f_ref[...],
                      preferred_element_type=f32) + b2f_ref[...])

    # Fusion layer 1: concat([he, hf]) @ wf1  ==  he @ wf1[:128] + hf @ wf1[128:]
    fused = relu(
        jnp.dot(he.astype(bf16), wf1e_ref[...], preferred_element_type=f32)
        + jnp.dot(hf.astype(bf16), wf1f_ref[...], preferred_element_type=f32)
        + bf1_ref[...]
    )

    # Fusion layer 2: Linear(128, 2), padded to 8 output lanes.
    logits = jnp.dot(fused.astype(bf16), wf2_ref[...],
                     preferred_element_type=f32) + bf2_ref[...]
    out_ref[...] = logits.astype(out_ref.dtype)


# -----------------------------------------------------------------------------
# Wrapper
# -----------------------------------------------------------------------------
_WEIGHT_ORDER = ("w1e", "b1e", "w2e", "b2e",
                 "w1f", "b1f", "w2f", "b2f",
                 "wf1e", "wf1f", "bf1", "wf2", "bf2")


def simple_model_forward(eeg, face, packed, *, block_b=512):
    """Full SimpleModel forward. `packed` comes from pack_params()."""
    B = eeg.shape[0]

    # Batch tile: multiple of 8 (f32 sublane), default 512 rows, never bigger
    # than the (rounded-up) batch.  No input padding: pl.cdiv grid + masked
    # ragged last tile.
    TB = min(_round_up(block_b, 8), _round_up(B, 8))
    # v7x megacore: for non-trivial batches make sure there are >=2 grid steps
    # so the "parallel" axis can be split across the two TensorCores.
    if B >= 64 and pl.cdiv(B, TB) < 2:
        TB = _round_up(pl.cdiv(B, 2), 8)
    nb = pl.cdiv(B, TB)

    weight_args = tuple(packed[k] for k in _WEIGHT_ORDER)

    def row_spec(dim):
        return pl.BlockSpec((TB, dim), lambda i: (i, 0))

    def const_spec(arr):
        # Full-array block, same block index every grid step -> DMA'd once,
        # stays VMEM-resident across the batch loop.
        return pl.BlockSpec(arr.shape, lambda i: (0, 0))

    flops = 2 * B * (
        EEG_DIM * HIDDEN_DIM            # eeg @ w1e
        + HIDDEN_DIM * HIDDEN_DIM       # he @ w2e
        + FACE_DIM * HIDDEN_DIM         # face @ w1f
        + HIDDEN_DIM * HIDDEN_DIM       # hf @ w2f
        + 2 * HIDDEN_DIM * HIDDEN_DIM   # fusion layer 1 (row-split wf1)
        + HIDDEN_DIM * OUT_PAD          # fused @ wf2 (padded)
    )
    bytes_accessed = (
        eeg.size * eeg.dtype.itemsize
        + face.size * face.dtype.itemsize
        + B * OUT_PAD * 4
        + sum(int(a.size) * a.dtype.itemsize for a in weight_args)
    )

    out = pl.pallas_call(
        _fused_mlp_kernel,
        out_shape=jax.ShapeDtypeStruct((B, OUT_PAD), jnp.float32),
        grid=(nb,),
        in_specs=[row_spec(EEG_DIM), row_spec(FACE_DIM)]
        + [const_spec(a) for a in weight_args],
        out_specs=pl.BlockSpec((TB, OUT_PAD), lambda i: (i, 0)),
        compiler_params=pltpu.CompilerParams(
            dimension_semantics=("parallel",),
        ),
        cost_estimate=pl.CostEstimate(
            flops=flops, transcendentals=0, bytes_accessed=bytes_accessed
        ),
    )(eeg, face, *weight_args)

    return out[:, :OUTPUT_DIM]


# -----------------------------------------------------------------------------
# Parameter construction / packing
# -----------------------------------------------------------------------------
def _linear_init(key, fan_in, fan_out):
    """PyTorch-style nn.Linear init: U(-1/sqrt(fan_in), ...); W stored as (in, out)."""
    kw, kb = jax.random.split(key)
    bound = 1.0 / jnp.sqrt(jnp.float32(fan_in))
    w = jax.random.uniform(kw, (fan_in, fan_out), jnp.float32, -bound, bound)
    b = jax.random.uniform(kb, (1, fan_out), jnp.float32, -bound, bound)
    return w, b


def init_raw_params(key):
    ks = jax.random.split(key, 6)
    w1e, b1e = _linear_init(ks[0], EEG_DIM, HIDDEN_DIM)
    w2e, b2e = _linear_init(ks[1], HIDDEN_DIM, HIDDEN_DIM)
    w1f, b1f = _linear_init(ks[2], FACE_DIM, HIDDEN_DIM)
    w2f, b2f = _linear_init(ks[3], HIDDEN_DIM, HIDDEN_DIM)
    wf1, bf1 = _linear_init(ks[4], 2 * HIDDEN_DIM, HIDDEN_DIM)
    wf2, bf2 = _linear_init(ks[5], HIDDEN_DIM, OUTPUT_DIM)
    return {
        "w1e": w1e, "b1e": b1e, "w2e": w2e, "b2e": b2e,
        "w1f": w1f, "b1f": b1f, "w2f": w2f, "b2f": b2f,
        "wf1": wf1, "bf1": bf1, "wf2": wf2, "bf2": bf2,
    }


def pack_params(raw):
    """Pack into the bf16, unpadded-width layout used by the kernel."""
    bf16 = lambda a: a.astype(jnp.bfloat16)
    H = HIDDEN_DIM
    wf2_p = jnp.zeros((H, OUT_PAD), jnp.float32).at[:, :OUTPUT_DIM].set(raw["wf2"])
    bf2_p = jnp.zeros((1, OUT_PAD), jnp.float32).at[:, :OUTPUT_DIM].set(raw["bf2"])
    return {
        "w1e": bf16(raw["w1e"]), "b1e": raw["b1e"],
        "w2e": bf16(raw["w2e"]), "b2e": raw["b2e"],
        "w1f": bf16(raw["w1f"]), "b1f": raw["b1f"],
        "w2f": bf16(raw["w2f"]), "b2f": raw["b2f"],
        "wf1e": bf16(raw["wf1"][:H]),   # rows for eeg features (concat fold)
        "wf1f": bf16(raw["wf1"][H:]),   # rows for face features
        "bf1": raw["bf1"],
        "wf2": bf16(wf2_p), "bf2": bf2_p,
    }


# -----------------------------------------------------------------------------
# References
# -----------------------------------------------------------------------------
def reference_forward_f32(eeg, face, raw):
    """Pure-JAX f32 reference with the original (unpacked) math — the module spec."""
    relu = lambda x: jnp.maximum(x, 0.0)
    he = relu(eeg @ raw["w1e"] + raw["b1e"])
    he = relu(he @ raw["w2e"] + raw["b2e"])
    hf = relu(face @ raw["w1f"] + raw["b1f"])
    hf = relu(hf @ raw["w2f"] + raw["b2f"])
    combined = jnp.concatenate([he, hf], axis=1)
    fused = relu(combined @ raw["wf1"] + raw["bf1"])
    return fused @ raw["wf2"] + raw["bf2"]


def reference_forward_matched(eeg, face, packed):
    """Pure-JAX reference using the kernel's exact precision path (bf16 in, f32 acc)."""
    bf16 = jnp.bfloat16
    f32 = jnp.float32
    relu = lambda x: jnp.maximum(x, 0.0)
    he = relu(jnp.dot(eeg.astype(bf16), packed["w1e"], preferred_element_type=f32)
              + packed["b1e"])
    he = relu(jnp.dot(he.astype(bf16), packed["w2e"], preferred_element_type=f32)
              + packed["b2e"])
    hf = relu(jnp.dot(face.astype(bf16), packed["w1f"], preferred_element_type=f32)
              + packed["b1f"])
    hf = relu(jnp.dot(hf.astype(bf16), packed["w2f"], preferred_element_type=f32)
              + packed["b2f"])
    fused = relu(jnp.dot(he.astype(bf16), packed["wf1e"], preferred_element_type=f32)
                 + jnp.dot(hf.astype(bf16), packed["wf1f"], preferred_element_type=f32)
                 + packed["bf1"])
    out = (jnp.dot(fused.astype(bf16), packed["wf2"], preferred_element_type=f32)
           + packed["bf2"])
    return out[:, :OUTPUT_DIM]


if __name__ == "__main__":
    key = jax.random.PRNGKey(0)
    k_eeg, k_face, k_params = jax.random.split(key, 3)

    B = 4
    eeg = jax.random.normal(k_eeg, (B, EEG_DIM), jnp.float32)
    face = jax.random.normal(k_face, (B, FACE_DIM), jnp.float32)

    raw = init_raw_params(k_params)
    packed = pack_params(raw)

    logits = simple_model_forward(eeg, face, packed)
    logits = jax.block_until_ready(logits)
    assert logits.shape == (B, OUTPUT_DIM)

    # Tight check: kernel must match the same-precision (bf16-in / f32-acc) math.
    ref_matched = reference_forward_matched(eeg, face, packed)
    assert jnp.allclose(logits, ref_matched, atol=5e-3, rtol=5e-3), (
        float(jnp.max(jnp.abs(logits - ref_matched)))
    )

    # Loose check: semantics match the original f32 PyTorch-style forward
    # (difference is only the deliberate bf16 weight/activation cast).
    ref_f32 = reference_forward_f32(eeg, face, raw)
    assert jnp.allclose(logits, ref_f32, atol=5e-2, rtol=5e-2), (
        float(jnp.max(jnp.abs(logits - ref_f32)))
    )

    print("KERNEL_OK")
</pallas_src>

<mosaic_0001>
module attributes {stable_mosaic.version = 11 : i64} {
  func.func @_fused_mlp_kernel(%arg0: i32, %arg1: memref<8x32xf32, #tpu.memory_space<vmem>>, %arg2: memref<8x768xf32, #tpu.memory_space<vmem>>, %arg3: memref<32x128xbf16, #tpu.memory_space<vmem>>, %arg4: memref<1x128xf32, #tpu.memory_space<vmem>>, %arg5: memref<128x128xbf16, #tpu.memory_space<vmem>>, %arg6: memref<1x128xf32, #tpu.memory_space<vmem>>, %arg7: memref<768x128xbf16, #tpu.memory_space<vmem>>, %arg8: memref<1x128xf32, #tpu.memory_space<vmem>>, %arg9: memref<128x128xbf16, #tpu.memory_space<vmem>>, %arg10: memref<1x128xf32, #tpu.memory_space<vmem>>, %arg11: memref<128x128xbf16, #tpu.memory_space<vmem>>, %arg12: memref<128x128xbf16, #tpu.memory_space<vmem>>, %arg13: memref<1x128xf32, #tpu.memory_space<vmem>>, %arg14: memref<128x8xbf16, #tpu.memory_space<vmem>>, %arg15: memref<1x8xf32, #tpu.memory_space<vmem>>, %arg16: memref<8x8xf32, #tpu.memory_space<vmem>>) attributes {dimension_semantics = [#tpu.dimension_semantics<parallel>], iteration_bounds = array<i64: 1>, scalar_prefetch = 0 : i64, scratch_operands = 0 : i64, tpu.core_type = #tpu.core_type<tc>, window_params = [{transform_indices = @transform_0, window_bounds = array<i64: 8, 32>}, {transform_indices = @transform_1, window_bounds = array<i64: 8, 768>}, {pipeline_mode = #tpu.pipeline_mode<synchronous>, transform_indices = @transform_2, window_bounds = array<i64: 32, 128>}, {pipeline_mode = #tpu.pipeline_mode<synchronous>, transform_indices = @transform_3, window_bounds = array<i64: 1, 128>}, {pipeline_mode = #tpu.pipeline_mode<synchronous>, transform_indices = @transform_4, window_bounds = array<i64: 128, 128>}, {pipeline_mode = #tpu.pipeline_mode<synchronous>, transform_indices = @transform_5, window_bounds = array<i64: 1, 128>}, {pipeline_mode = #tpu.pipeline_mode<synchronous>, transform_indices = @transform_6, window_bounds = array<i64: 768, 128>}, {pipeline_mode = #tpu.pipeline_mode<synchronous>, transform_indices = @transform_7, window_bounds = array<i64: 1, 128>}, {pipeline_mode = #tpu.pipeline_mode<synchronous>, transform_indices = @transform_8, window_bounds = array<i64: 128, 128>}, {pipeline_mode = #tpu.pipeline_mode<synchronous>, transform_indices = @transform_9, window_bounds = array<i64: 1, 128>}, {pipeline_mode = #tpu.pipeline_mode<synchronous>, transform_indices = @transform_10, window_bounds = array<i64: 128, 128>}, {pipeline_mode = #tpu.pipeline_mode<synchronous>, transform_indices = @transform_11, window_bounds = array<i64: 128, 128>}, {pipeline_mode = #tpu.pipeline_mode<synchronous>, transform_indices = @transform_12, window_bounds = array<i64: 1, 128>}, {pipeline_mode = #tpu.pipeline_mode<synchronous>, transform_indices = @transform_13, window_bounds = array<i64: 128, 8>}, {pipeline_mode = #tpu.pipeline_mode<synchronous>, transform_indices = @transform_14, window_bounds = array<i64: 1, 8>}, {transform_indices = @transform_15, window_bounds = array<i64: 8, 8>}]} {
    %c0 = arith.constant 0 : index
    %c0_0 = arith.constant 0 : index
    %0 = vector.load %arg1[%c0, %c0_0] : memref<8x32xf32, #tpu.memory_space<vmem>>, vector<8x32xf32>
    %1 = arith.truncf %0 : vector<8x32xf32> to vector<8x32xbf16>
    %c0_1 = arith.constant 0 : index
    %c0_2 = arith.constant 0 : index
    %2 = vector.load %arg3[%c0_1, %c0_2] : memref<32x128xbf16, #tpu.memory_space<vmem>>, vector<32x128xbf16>
    %cst = arith.constant dense<0.000000e+00> : vector<8x128xf32>
    %3 = tpu.matmul %1, %2, %cst {dimension_numbers = #tpu.dot_dimension_numbers<[1], [0], [0], [1], [0, 0, 1, 1], [], []>} : vector<8x32xbf16>, vector<32x128xbf16>, vector<8x128xf32> -> vector<8x128xf32>
    %c0_3 = arith.constant 0 : index
    %c0_4 = arith.constant 0 : index
    %4 = vector.load %arg4[%c0_3, %c0_4] : memref<1x128xf32, #tpu.memory_space<vmem>>, vector<1x128xf32>
    %5 = vector.broadcast %4 : vector<1x128xf32> to vector<8x128xf32>
    %6 = arith.addf %3, %5 : vector<8x128xf32>
    %cst_5 = arith.constant 0.000000e+00 : f32
    %7 = vector.broadcast %cst_5 : f32 to vector<8x128xf32>
    %8 = arith.maximumf %6, %7 : vector<8x128xf32>
    %9 = arith.truncf %8 : vector<8x128xf32> to vector<8x128xbf16>
    %c0_6 = arith.constant 0 : index
    %c0_7 = arith.constant 0 : index
    %10 = vector.load %arg5[%c0_6, %c0_7] : memref<128x128xbf16, #tpu.memory_space<vmem>>, vector<128x128xbf16>
    %cst_8 = arith.constant dense<0.000000e+00> : vector<8x128xf32>
    %11 = tpu.matmul %9, %10, %cst_8 {dimension_numbers = #tpu.dot_dimension_numbers<[1], [0], [0], [1], [0, 0, 1, 1], [], []>} : vector<8x128xbf16>, vector<128x128xbf16>, vector<8x128xf32> -> vector<8x128xf32>
    %c0_9 = arith.constant 0 : index
    %c0_10 = arith.constant 0 : index
    %12 = vector.load %arg6[%c0_9, %c0_10] : memref<1x128xf32, #tpu.memory_space<vmem>>, vector<1x128xf32>
    %13 = vector.broadcast %12 : vector<1x128xf32> to vector<8x128xf32>
    %14 = arith.addf %11, %13 : vector<8x128xf32>
    %cst_11 = arith.constant 0.000000e+00 : f32
    %15 = vector.broadcast %cst_11 : f32 to vector<8x128xf32>
    %16 = arith.maximumf %14, %15 : vector<8x128xf32>
    %c0_12 = arith.constant 0 : index
    %c0_13 = arith.constant 0 : index
    %17 = vector.load %arg2[%c0_12, %c0_13] : memref<8x768xf32, #tpu.memory_space<vmem>>, vector<8x768xf32>
    %18 = arith.truncf %17 : vector<8x768xf32> to vector<8x768xbf16>
    %c0_14 = arith.constant 0 : index
    %c0_15 = arith.constant 0 : index
    %19 = vector.load %arg7[%c0_14, %c0_15] : memref<768x128xbf16, #tpu.memory_space<vmem>>, vector<768x128xbf16>
    %cst_16 = arith.constant dense<0.000000e+00> : vector<8x128xf32>
    %20 = tpu.matmul %18, %19, %cst_16 {dimension_numbers = #tpu.dot_dimension_numbers<[1], [0], [0], [1], [0, 0, 1, 1], [], []>} : vector<8x768xbf16>, vector<768x128xbf16>, vector<8x128xf32> -> vector<8x128xf32>
    %c0_17 = arith.constant 0 : index
    %c0_18 = arith.constant 0 : index
    %21 = vector.load %arg8[%c0_17, %c0_18] : memref<1x128xf32, #tpu.memory_space<vmem>>, vector<1x128xf32>
    %22 = vector.broadcast %21 : vector<1x128xf32> to vector<8x128xf32>
    %23 = arith.addf %20, %22 : vector<8x128xf32>
    %cst_19 = arith.constant 0.000000e+00 : f32
    %24 = vector.broadcast %cst_19 : f32 to vector<8x128xf32>
    %25 = arith.maximumf %23, %24 : vector<8x128xf32>
    %26 = arith.truncf %25 : vector<8x128xf32> to vector<8x128xbf16>
    %c0_20 = arith.constant 0 : index
    %c0_21 = arith.constant 0 : index
    %27 = vector.load %arg9[%c0_20, %c0_21] : memref<128x128xbf16, #tpu.memory_space<vmem>>, vector<128x128xbf16>
    %cst_22 = arith.constant dense<0.000000e+00> : vector<8x128xf32>
    %28 = tpu.matmul %26, %27, %cst_22 {dimension_numbers = #tpu.dot_dimension_numbers<[1], [0], [0], [1], [0, 0, 1, 1], [], []>} : vector<8x128xbf16>, vector<128x128xbf16>, vector<8x128xf32> -> vector<8x128xf32>
    %c0_23 = arith.constant 0 : index
    %c0_24 = arith.constant 0 : index
    %29 = vector.load %arg10[%c0_23, %c0_24] : memref<1x128xf32, #tpu.memory_space<vmem>>, vector<1x128xf32>
    %30 = vector.broadcast %29 : vector<1x128xf32> to vector<8x128xf32>
    %31 = arith.addf %28, %30 : vector<8x128xf32>
    %cst_25 = arith.constant 0.000000e+00 : f32
    %32 = vector.broadcast %cst_25 : f32 to vector<8x128xf32>
    %33 = arith.maximumf %31, %32 : vector<8x128xf32>
    %34 = arith.truncf %16 : vector<8x128xf32> to vector<8x128xbf16>
    %c0_26 = arith.constant 0 : index
    %c0_27 = arith.constant 0 : index
    %35 = vector.load %arg11[%c0_26, %c0_27] : memref<128x128xbf16, #tpu.memory_space<vmem>>, vector<128x128xbf16>
    %cst_28 = arith.constant dense<0.000000e+00> : vector<8x128xf32>
    %36 = tpu.matmul %34, %35, %cst_28 {dimension_numbers = #tpu.dot_dimension_numbers<[1], [0], [0], [1], [0, 0, 1, 1], [], []>} : vector<8x128xbf16>, vector<128x128xbf16>, vector<8x128xf32> -> vector<8x128xf32>
    %37 = arith.truncf %33 : vector<8x128xf32> to vector<8x128xbf16>
    %c0_29 = arith.constant 0 : index
    %c0_30 = arith.constant 0 : index
    %38 = vector.load %arg12[%c0_29, %c0_30] : memref<128x128xbf16, #tpu.memory_space<vmem>>, vector<128x128xbf16>
    %cst_31 = arith.constant dense<0.000000e+00> : vector<8x128xf32>
    %39 = tpu.matmul %37, %38, %cst_31 {dimension_numbers = #tpu.dot_dimension_numbers<[1], [0], [0], [1], [0, 0, 1, 1], [], []>} : vector<8x128xbf16>, vector<128x128xbf16>, vector<8x128xf32> -> vector<8x128xf32>
    %40 = arith.addf %36, %39 : vector<8x128xf32>
    %c0_32 = arith.constant 0 : index
    %c0_33 = arith.constant 0 : index
    %41 = vector.load %arg13[%c0_32, %c0_33] : memref<1x128xf32, #tpu.memory_space<vmem>>, vector<1x128xf32>
    %42 = vector.broadcast %41 : vector<1x128xf32> to vector<8x128xf32>
    %43 = arith.addf %40, %42 : vector<8x128xf32>
    %cst_34 = arith.constant 0.000000e+00 : f32
    %44 = vector.broadcast %cst_34 : f32 to vector<8x128xf32>
    %45 = arith.maximumf %43, %44 : vector<8x128xf32>
    %46 = arith.truncf %45 : vector<8x128xf32> to vector<8x128xbf16>
    %c0_35 = arith.constant 0 : index
    %c0_36 = arith.constant 0 : index
    %47 = vector.load %arg14[%c0_35, %c0_36] : memref<128x8xbf16, #tpu.memory_space<vmem>>, vector<128x8xbf16>
    %cst_37 = arith.constant dense<0.000000e+00> : vector<8x8xf32>
    %48 = tpu.matmul %46, %47, %cst_37 {dimension_numbers = #tpu.dot_dimension_numbers<[1], [0], [0], [1], [0, 0, 1, 1], [], []>} : vector<8x128xbf16>, vector<128x8xbf16>, vector<8x8xf32> -> vector<8x8xf32>
    %c0_38 = arith.constant 0 : index
    %c0_39 = arith.constant 0 : index
    %49 = vector.load %arg15[%c0_38, %c0_39] : memref<1x8xf32, #tpu.memory_space<vmem>>, vector<1x8xf32>
    %50 = vector.broadcast %49 : vector<1x8xf32> to vector<8x8xf32>
    %51 = arith.addf %48, %50 : vector<8x8xf32>
    %c0_40 = arith.constant 0 : index
    %c0_41 = arith.constant 0 : index
    %52 = vector.load %arg16[%c0_40, %c0_41] : memref<8x8xf32, #tpu.memory_space<vmem>>, vector<8x8xf32>
    tpu.vector_store %arg16[%c0_40, %c0_41], %51 {strides = array<i32>} : memref<8x8xf32, #tpu.memory_space<vmem>>, vector<8x8xf32>,
    return
  }
  func.func @transform_0(%arg0: i32) -> (i32, i32) {
    %c0_i32 = arith.constant 0 : i32
    %c0_i32_0 = arith.constant 0 : i32
    return %arg0, %c0_i32 : i32, i32
  }
  func.func @transform_1(%arg0: i32) -> (i32, i32) {
    %c0_i32 = arith.constant 0 : i32
    %c0_i32_0 = arith.constant 0 : i32
    return %arg0, %c0_i32 : i32, i32
  }
  func.func @transform_2(%arg0: i32) -> (i32, i32) {
    %c0_i32 = arith.constant 0 : i32
    %c0_i32_0 = arith.constant 0 : i32
    %c0_i32_1 = arith.constant 0 : i32
    return %c0_i32, %c0_i32_0 : i32, i32
  }
  func.func @transform_3(%arg0: i32) -> (i32, i32) {
    %c0_i32 = arith.constant 0 : i32
    %c0_i32_0 = arith.constant 0 : i32
    %c0_i32_1 = arith.constant 0 : i32
    return %c0_i32, %c0_i32_0 : i32, i32
  }
  func.func @transform_4(%arg0: i32) -> (i32, i32) {
    %c0_i32 = arith.constant 0 : i32
    %c0_i32_0 = arith.constant 0 : i32
    %c0_i32_1 = arith.constant 0 : i32
    return %c0_i32, %c0_i32_0 : i32, i32
  }
  func.func @transform_5(%arg0: i32) -> (i32, i32) {
    %c0_i32 = arith.constant 0 : i32
    %c0_i32_0 = arith.constant 0 : i32
    %c0_i32_1 = arith.constant 0 : i32
    return %c0_i32, %c0_i32_0 : i32, i32
  }
  func.func @transform_6(%arg0: i32) -> (i32, i32) {
    %c0_i32 = arith.constant 0 : i32
    %c0_i32_0 = arith.constant 0 : i32
    %c0_i32_1 = arith.constant 0 : i32
    return %c0_i32, %c0_i32_0 : i32, i32
  }
  func.func @transform_7(%arg0: i32) -> (i32, i32) {
    %c0_i32 = arith.constant 0 : i32
    %c0_i32_0 = arith.constant 0 : i32
    %c0_i32_1 = arith.constant 0 : i32
    return %c0_i32, %c0_i32_0 : i32, i32
  }
  func.func @transform_8(%arg0: i32) -> (i32, i32) {
    %c0_i32 = arith.constant 0 : i32
    %c0_i32_0 = arith.constant 0 : i32
    %c0_i32_1 = arith.constant 0 : i32
    return %c0_i32, %c0_i32_0 : i32, i32
  }
  func.func @transform_9(%arg0: i32) -> (i32, i32) {
    %c0_i32 = arith.constant 0 : i32
    %c0_i32_0 = arith.constant 0 : i32
    %c0_i32_1 = arith.constant 0 : i32
    return %c0_i32, %c0_i32_0 : i32, i32
  }
  func.func @transform_10(%arg0: i32) -> (i32, i32) {
    %c0_i32 = arith.constant 0 : i32
    %c0_i32_0 = arith.constant 0 : i32
    %c0_i32_1 = arith.constant 0 : i32
    return %c0_i32, %c0_i32_0 : i32, i32
  }
  func.func @transform_11(%arg0: i32) -> (i32, i32) {
    %c0_i32 = arith.constant 0 : i32
    %c0_i32_0 = arith.constant 0 : i32
    %c0_i32_1 = arith.constant 0 : i32
    return %c0_i32, %c0_i32_0 : i32, i32
  }
  func.func @transform_12(%arg0: i32) -> (i32, i32) {
    %c0_i32 = arith.constant 0 : i32
    %c0_i32_0 = arith.constant 0 : i32
    %c0_i32_1 = arith.constant 0 : i32
    return %c0_i32, %c0_i32_0 : i32, i32
  }
  func.func @transform_13(%arg0: i32) -> (i32, i32) {
    %c0_i32 = arith.constant 0 : i32
    %c0_i32_0 = arith.constant 0 : i32
    %c0_i32_1 = arith.constant 0 : i32
    return %c0_i32, %c0_i32_0 : i32, i32
  }
  func.func @transform_14(%arg0: i32) -> (i32, i32) {
    %c0_i32 = arith.constant 0 : i32
    %c0_i32_0 = arith.constant 0 : i32
    %c0_i32_1 = arith.constant 0 : i32
    return %c0_i32, %c0_i32_0 : i32, i32
  }
  func.func @transform_15(%arg0: i32) -> (i32, i32) {
    %c0_i32 = arith.constant 0 : i32
    %c0_i32_0 = arith.constant 0 : i32
    return %arg0, %c0_i32 : i32, i32
  }
}

</mosaic_0001>

<bundles_post_ra>
// kernel: tpu_custom_call.1
= control target key start
LH: loop header
LB: loop body
LE: loop exit
PB: predicated region body
PF: predicated region fallthrough
CT: control target
= control target key end

     0   :  { %20 = vsyncpa [#allocation3], 0  ;;  %s2161_s0 = inlined_call_operand.vmem [shape: f32[4,32], index: 0, kind: input, shape index: {}]   ;;  %s2162_s1 = inlined_call_operand.hbm [shape: f32[4,768], index: 1, kind: input, shape index: {}]   ;;  %s2163_s2 = inlined_call_operand.hbm [shape: bf16[32,128], index: 2, kind: input, shape index: {}]   ;;  %s2164_s3 = inlined_call_operand.vmem [shape: f32[1,128], index: 3, kind: input, shape index: {}]   ;;  %s2165_s4 = inlined_call_operand.vmem [shape: bf16[128,128], index: 4, kind: input, shape index: {}]   ;;  %s2166_s5 = inlined_call_operand.vmem [shape: f32[1,128], index: 5, kind: input, shape index: {}]   ;;  %s2167_s6 = inlined_call_operand.hbm [shape: bf16[768,128], index: 6, kind: input, shape index: {}]   ;;  %s2168_s7 = inlined_call_operand.vmem [shape: f32[1,128], index: 7, kind: input, shape index: {}]   ;;  %s2169_s8 = inlined_call_operand.hbm [shape: bf16[128,128], index: 8, kind: input, shape index: {}]   ;;  %s2170_s9 = inlined_call_operand.vmem [shape: f32[1,128], index: 9, kind: input, shape index: {}]   ;;  %s2171_s10 = inlined_call_operand.hbm [shape: bf16[128,128], index: 10, kind: input, shape index: {}]   ;;  %s2172_s11 = inlined_call_operand.hbm [shape: bf16[128,128], index: 11, kind: input, shape index: {}]   ;;  %s2173_s12 = inlined_call_operand.vmem [shape: f32[1,128], index: 12, kind: input, shape index: {}]   ;;  %s2174_s13 = inlined_call_operand.vmem [shape: bf16[128,8], index: 13, kind: input, shape index: {}]   ;;  %s2175_s14 = inlined_call_operand.vmem [shape: f32[1,8], index: 14, kind: input, shape index: {}]   ;;  %s2176_s15 = inlined_call_operand.hbm [shape: f32[4,8], index: 15, kind: output, shape index: {}]  }
   0x1   :  { %21 = vsyncpa [#allocation6], 0 }
   0x2   :  { %22 = vsyncpa [#allocation9], 0 }
   0x3   :  { %23 = vsyncpa [#allocation12], 0 }
   0x4   :  { %24 = vsyncpa [#allocation4], 0 }
   0x5   :  { %31 = vsyncadd [#allocation3], 384  ;;  %s1906_s18 = smov [#allocation5]  }
   0x6   :  { %s44_s19 = sshll.u32 %s1906_s18, 4  ;;  %s45_s19 = int_to_ptr.vmem [resolvable:$true] %s44_s19 }
   0x7   :  { %s1764_s20 = scalar_lea.vmem %s45_s19, 256  ;;  %p1769_p1 = scmp.lt.s32.totalorder %s45_s19, %s45_s19 }
   0x8   :  { %p1765_p0 = scmp.ne.s32.totalorder %s45_s19, %s1764_s20  ;;  %p1770_p2 = scmp.lt.s32.totalorder %s1764_s20, %s1764_s20 }
   0xa   :  { %p1771_p3 = por %p1770_p2, %p1769_p1 }
   0xc   :  { %p1772_p4 = pnand %p1771_p3, %p1765_p0 }
   0xe   :  { %1775 = shalt.err (!%p1772_p4)
}
   0xf   :  { %s1907_s21 = smov 64   ;;  %s1908_s22 = smov 4  }
  0x10   :  { %50 = dma.hbm_to_vmem [thread:$0]  %s2163_s2, 256, %s45_s19, [#allocation6], %s1907_s21, %s1907_s21, %s1908_s22  }
  0x11   :  { %s1909_s25 = smov [#allocation8]   ;;  %s1910_s27 = smov [#allocation2]  }
  0x12   :  { %s76_s26 = sshll.u32 %s1909_s25, 4  ;;  %s32_s28 = sshll.u32 %s1910_s27, 4  ;;  %s77_s26 = int_to_ptr.vmem [resolvable:$true] %s76_s26  ;;  %s33_s28 = int_to_ptr.vmem [resolvable:$true] %s32_s28 }
  0x13   :  { %s1784_s29 = scalar_lea.vmem %s77_s26, 1024  ;;  %p1789_p6 = scmp.lt.s32.totalorder %s77_s26, %s77_s26 }
  0x14   :  { %p1785_p5 = scmp.ne.s32.totalorder %s77_s26, %s1784_s29  ;;  %p1790_p7 = scmp.lt.s32.totalorder %s1784_s29, %s1784_s29 }
  0x16   :  { %p1791_p8 = por %p1790_p7, %p1789_p6 }
  0x18   :  { %p1792_p9 = pnand %p1791_p8, %p1785_p5 }
  0x1a   :  { %1795 = shalt.err (!%p1792_p9)
}
  0x1b   :  { %82 = dma.hbm_to_vmem [thread:$0]  %s2169_s8, 1024, %s77_s26, [#allocation9], %s1907_s21, %s1907_s21, %s1908_s22  }
  0x1c   :  { %s1804_s2 = scalar_lea.vmem %s33_s28, 384  ;;  %s1808_s17 = scalar_lea.vmem %s33_s28, 768 }
  0x1d   :  { %p1805_p10 = scmp.ne.s32.totalorder %s33_s28, %s1804_s2  ;;  %p1809_p11 = scmp.lt.s32.totalorder %s33_s28, %s33_s28 }
  0x1e   :  { %p1810_p12 = scmp.lt.s32.totalorder %s1808_s17, %s1804_s2 }
  0x20   :  { %p1811_p13 = por %p1810_p12, %p1809_p11 }
  0x22   :  { %p1812_p0 = pnand %p1811_p13, %p1805_p10 }
  0x24   :  { %1815 = shalt.err (!%p1812_p0)
}
  0x25   :  { %s1911_s18 = smov 384   ;;  %s1912_s19 = smov 24  }
  0x26   :  { %38 = dma.hbm_to_vmem [thread:$0]  %s2162_s1, 384, %s33_s28, [#allocation3], %s1911_s18, %s1911_s18, %s1912_s19  }
  0x27   :  { %s1913_s24 = smov [#allocation7]   ;;  %s1914_s27 = smov [#allocation10]  }
  0x28   :  { %s62_s25 = sshll.u32 %s1913_s24, 4  ;;  %s90_s8 = sshll.u32 %s1914_s27, 4  ;;  %s63_s25 = int_to_ptr.vmem [resolvable:$true] %s62_s25  ;;  %s91_s8 = int_to_ptr.vmem [resolvable:$true] %s90_s8 }
  0x29   :  { %s1824_s26 = scalar_lea.vmem %s63_s25, 6144  ;;  %p1829_p2 = scmp.lt.s32.totalorder %s63_s25, %s63_s25 }
  0x2a   :  { %p1825_p1 = scmp.ne.s32.totalorder %s63_s25, %s1824_s26  ;;  %p1830_p3 = scmp.lt.s32.totalorder %s1824_s26, %s1824_s26 }
  0x2c   :  { %p1831_p4 = por %p1830_p3, %p1829_p2 }
  0x2e   :  { %p1832_p5 = pnand %p1831_p4, %p1825_p1 }
  0x30   :  { %1835 = shalt.err (!%p1832_p5)
}
  0x31   :  { %68 = dma.hbm_to_vmem [thread:$0]  %s2167_s6, 6144, %s63_s25, [#allocation6], %s1907_s21, %s1907_s21, %s1908_s22  }
  0x32   :  { %s1844_s1 = scalar_lea.vmem %s91_s8, 1024  ;;  %p1849_p7 = scmp.lt.s32.totalorder %s91_s8, %s91_s8 }
  0x33   :  { %p1845_p6 = scmp.ne.s32.totalorder %s91_s8, %s1844_s1  ;;  %p1850_p8 = scmp.lt.s32.totalorder %s1844_s1, %s1844_s1 }
  0x35   :  { %p1851_p9 = por %p1850_p8, %p1849_p7 }
  0x37   :  { %p1852_p10 = pnand %p1851_p9, %p1845_p6 }
  0x39   :  { %1855 = shalt.err (!%p1852_p10)
}
  0x3a   :  { %96 = dma.hbm_to_vmem [thread:$0]  %s2171_s10, 1024, %s91_s8, [#allocation9], %s1907_s21, %s1907_s21, %s1908_s22  }
  0x3b   :  { %s1915_s2 = smov [#allocation11]  }
  0x3c   :  { %s102_s17 = sshll.u32 %s1915_s2, 4  ;;  %s103_s17 = int_to_ptr.vmem [resolvable:$true] %s102_s17 }
  0x3d   :  { %s1864_s18 = scalar_lea.vmem %s103_s17, 1024  ;;  %p1869_p12 = scmp.lt.s32.totalorder %s103_s17, %s103_s17 }
  0x3e   :  { %p1865_p11 = scmp.ne.s32.totalorder %s103_s17, %s1864_s18  ;;  %p1870_p13 = scmp.lt.s32.totalorder %s1864_s18, %s1864_s18 }
  0x40   :  { %p1871_p0 = por %p1870_p13, %p1869_p12 }
  0x42   :  { %p1872_p1 = pnand %p1871_p0, %p1865_p11 }
  0x44   :  { %1875 = shalt.err (!%p1872_p1)
}
  0x45   :  { %108 = dma.hbm_to_vmem [thread:$0]  %s2172_s11, 1024, %s103_s17, [#allocation12], %s1907_s21, %s1907_s21, %s1908_s22  }
  0x46   :  { %1896 = dma.done.wait [#allocation3], 768  }
  0x47   :  { %1897 = vsyncadd [#allocation3], 4294966528 }
  0x48   :  { %1898 = dma.done.wait [#allocation6], 6400  }
  0x49   :  { %1899 = vsyncadd [#allocation6], 4294960896 }
  0x4a   :  { %1900 = dma.done.wait [#allocation9], 2048  }
  0x4b   :  { %1901 = vsyncadd [#allocation9], 4294965248 }
  0x4c   :  { %1902 = dma.done.wait [#allocation12], 1024  }
  0x4d   :  { %1903 = vsyncadd [#allocation12], 4294966272  ;;  %v1916_v0 = vmov 0.0   ;;  %vm1917_vm0 = vmmov 0   ;;  %v1657_v1 = vld [vmem:[#allocation5 + $0x8] sm:$0xff]   ;;  %v1658_v2 = vld [vmem:[#allocation5] sm:$0xff]  }
  0x4e   :  { %1536 = vmatprep.subr.bf16.mxu0 %v1916_v0  ;;  %1540 = vmatprep.mubr.msk.bf16.mxu0 %vm1917_vm0, %v1916_v0  ;;  %v134_v3 = vld [vmem:[%s2161_s0] sm:$0xff]  ;;  %v1659_v4 = vld [vmem:[#allocation7 + $0x78] sm:$0xff]   ;;  %vm159_vm1 = vcmask 261120   ;;  %v1661_v8 = vld [vmem:[#allocation7 + $0x70] sm:$0xff]   ;;  %vm1303_vm2 = vcmask 64512  }
  0x4f   :  { %1544 = vmatprep.subr.bf16.mxu1 %v1916_v0  ;;  %1560 = vmatprep.mubr.msk.bf16.mxu1 %vm1917_vm0, %v1916_v0  ;;  %v135_v5 = vpack.c.bf16 %v134_v3, %v134_v3  ;;  %v1660_v6 = vld [vmem:[#allocation7 + $0x38] sm:$0xff]   ;;  %v1665_v9 = vld [vmem:[%s2165_s4 + $0x30] sm:$0xff]   ;;  %v1664_v11 = vld [vmem:[#allocation7 + $0x68] sm:$0xff]  }
  0x50   :  { %1537 = vmatpush3.bf16.msra.mxu0 %v1657_v1  ;;  %v1662_v7 = vld [vmem:[%s2165_s4 + $0x38] sm:$0xff]   ;;  %v1663_v10 = vld [vmem:[#allocation7 + $0x30] sm:$0xff]   ;;  %v1668_v12 = vld [vmem:[%s2165_s4 + $0x28] sm:$0xff]  }
  0x51   :  { %1538 = vmatprep.subr.bf16.mxu0 %v1916_v0  ;;  %1545 = vmatpush3.bf16.msra.mxu1 %v1662_v7  ;;  %v1666_v13 = vld [vmem:[#allocation7 + $0x28] sm:$0xff]   ;;  %v1667_v14 = vld [vmem:[#allocation7 + $0x60] sm:$0xff]   ;;  %v1670_v17 = vld [vmem:[#allocation7 + $0x58] sm:$0xff]  }
  0x52   :  { %1546 = vmatprep.subr.bf16.mxu1 %v1916_v0  ;;  %v1671_v15 = vld [vmem:[%s2165_s4 + $0x20] sm:$0xff]   ;;  %v1674_v18 = vld [vmem:[%s2165_s4 + $0x18] sm:$0xff]   ;;  %v1673_v20 = vld [vmem:[#allocation7 + $0x50] sm:$0xff]  }
  0x53   :  { %v1669_v16 = vld [vmem:[#allocation7 + $0x20] sm:$0xff]   ;;  %v1672_v19 = vld [vmem:[#allocation7 + $0x18] sm:$0xff]   ;;  %v1677_v21 = vld [vmem:[%s2165_s4 + $0x10] sm:$0xff]  }
  0x54   :  { %1539 = vmatpush3.bf16.msra.mxu0 %v1658_v2  ;;  %v1675_v22 = vld [vmem:[#allocation7 + $0x10] sm:$0xff]   ;;  %v1676_v23 = vld [vmem:[#allocation7 + $0x48] sm:$0xff]   ;;  %v1679_v26 = vld [vmem:[#allocation7 + $0x40] sm:$0xff]  }
  0x55   :  { %1434 = vmatprep.subr.bf16.mxu0 %v1659_v4  ;;  %1547 = vmatpush3.bf16.msra.mxu1 %v1665_v9  ;;  %v1680_v24 = vld [vmem:[%s2165_s4 + $0x8] sm:$0xff]   ;;  %v1681_v27 = vld [vmem:[#allocation7] sm:$0xff]   ;;  %v1685_v31 = vld [vmem:[#allocation7 + $0x178] sm:$0xff]  }
  0x56   :  { %1548 = vmatprep.subr.bf16.mxu1 %v1916_v0  ;;  %v1678_v25 = vld [vmem:[#allocation7 + $0x8] sm:$0xff]   ;;  %v1684_v28 = vld [vmem:[#allocation2 + $0x4] ss:$24 sps:$4 sm:$0xff]   ;;  %v1682_v29 = vld [vmem:[#allocation2] ss:$24 sps:$4 sm:$0xff]  }
  0x57   :  { %1541 = vmatmul.mubr.msk.bf16.vlgmr.msra.gmra.mxu0 %vm159_vm1, %v135_v5  ;;  %v342_v30 = vpack.c.bf16 %v1684_v28, %v1684_v28  ;;  %v341_v32 = vpack.c.bf16 %v1682_v29, %v1682_v29  ;;  %v1686_v33 = vld [vmem:[%s2165_s4] sm:$0xff]   ;;  %v1687_v34 = vld [vmem:[#allocation7 + $0x138] sm:$0xff]   ;;  %v1689_v36 = vld [vmem:[#allocation7 + $0x170] sm:$0xff]  }
  0x58   :  { %1435 = vmatpush3.bf16.msra.mxu0 %v1660_v6  ;;  %v1688_v35 = vld [vmem:[#allocation7 + $0xf8] sm:$0xff]   ;;  %v1691_v37 = vld [vmem:[#allocation7 + $0x130] sm:$0xff]   ;;  %v1693_v38 = vld [vmem:[#allocation7 + $0x168] sm:$0xff]  }
  0x59   :  { %1436 = vmatprep.subr.bf16.mxu0 %v1661_v8  ;;  %1549 = vmatpush3.bf16.msra.mxu1 %v1668_v12  ;;  %v1695_v39 = vld [vmem:[#allocation7 + $0x128] sm:$0xff]   ;;  %v1697_v40 = vld [vmem:[#allocation7 + $0x160] sm:$0xff]   ;;  %v1701_v42 = vld [vmem:[#allocation7 + $0x158] sm:$0xff]  }
  0x5a   :  { %1550 = vmatprep.subr.bf16.mxu1 %v1916_v0  ;;  %770 = vmatprep.mubr.bf16.mxu0 %v342_v30  ;;  %v1699_v41 = vld [vmem:[#allocation7 + $0x120] sm:$0xff]   ;;  %v1703_v43 = vld [vmem:[#allocation7 + $0x118] sm:$0xff]   ;;  %v1705_v44 = vld [vmem:[#allocation7 + $0x150] sm:$0xff]  }
  0x5b   :  { %v1707_v45 = vld [vmem:[#allocation7 + $0x110] sm:$0xff]   ;;  %v1709_v46 = vld [vmem:[#allocation7 + $0x148] sm:$0xff]   ;;  %v1713_v48 = vld [vmem:[#allocation7 + $0x140] sm:$0xff]  }
  0x5c   :  { %1437 = vmatpush3.bf16.msra.mxu0 %v1663_v10  ;;  %v1711_v47 = vld [vmem:[#allocation7 + $0x108] sm:$0xff]   ;;  %v1715_v49 = vld [vmem:[#allocation7 + $0x100] sm:$0xff]   ;;  %v1690_v61 = vld [vmem:[#allocation7 + $0xb8] sm:$0xff]  }
  0x5d   :  { %1438 = vmatprep.subr.bf16.mxu0 %v1664_v11  ;;  %1551 = vmatpush3.bf16.msra.mxu1 %v1671_v15  ;;  %v1718_v50 = vld [vmem:[#allocation2 + $0x14] ss:$24 sps:$4 sm:$0xff]   ;;  %v1716_v51 = vld [vmem:[#allocation2 + $0x10] ss:$24 sps:$4 sm:$0xff]   ;;  %v1325_v54 = vld [vmem:[%s2164_s3] ss:$0 sm:$0xff] }
  0x5e   :  { %1552 = vmatprep.subr.bf16.mxu1 %v1916_v0  ;;  %v346_v52 = vpack.c.bf16 %v1718_v50, %v1718_v50  ;;  %v345_v53 = vpack.c.bf16 %v1716_v51, %v1716_v51  ;;  %v1723_v56 = vld [vmem:[#allocation2 + $0xc] ss:$24 sps:$4 sm:$0xff]   ;;  %v1692_v1 = vld [vmem:[#allocation7 + $0xf0] sm:$0xff]   ;;  %v1704_v8 = vld [vmem:[#allocation7 + $0xd8] sm:$0xff]  }
  0x5f   :  { %v344_v62 = vpack.c.bf16 %v1723_v56, %v1723_v56  ;;  %v1694_v3 = vld [vmem:[#allocation7 + $0xb0] sm:$0xff]   ;;  %v1696_v4 = vld [vmem:[#allocation7 + $0xe8] sm:$0xff]   ;;  %v1700_v6 = vld [vmem:[#allocation7 + $0xe0] sm:$0xff]  }
  0x60   :  { %1439 = vmatpush3.bf16.msra.mxu0 %v1666_v13  ;;  %v1698_v5 = vld [vmem:[#allocation7 + $0xa8] sm:$0xff]   ;;  %v1702_v7 = vld [vmem:[#allocation7 + $0xa0] sm:$0xff]   ;;  %v1706_v9 = vld [vmem:[#allocation7 + $0x98] sm:$0xff]  }
  0x61   :  { %1440 = vmatprep.subr.bf16.mxu0 %v1667_v14  ;;  %1553 = vmatpush3.bf16.msra.mxu1 %v1674_v18  ;;  %v1708_v10 = vld [vmem:[#allocation7 + $0xd0] sm:$0xff]   ;;  %v1712_v12 = vld [vmem:[#allocation7 + $0xc8] sm:$0xff]   ;;  %v1719_v14 = vld [vmem:[#allocation7 + $0xc0] sm:$0xff]  }
  0x62   :  { %1554 = vmatprep.subr.bf16.mxu1 %v1916_v0  ;;  %v1710_v11 = vld [vmem:[#allocation7 + $0x90] sm:$0xff]   ;;  %v1714_v13 = vld [vmem:[#allocation7 + $0x88] sm:$0xff]   ;;  %v1732_v56 = vld [vmem:[#allocation10 + $0x38] sm:$0xff]  }
  0x63   :  { %v1721_v15 = vld [vmem:[#allocation2 + $0x8] ss:$24 sps:$4 sm:$0xff]  }
  0x64   :  { %1441 = vmatpush3.bf16.msra.mxu0 %v1669_v16  ;;  %v1720_v16 = vld [vmem:[#allocation7 + $0x80] sm:$0xff]  }
  0x65   :  { %1442 = vmatprep.subr.bf16.mxu0 %v1670_v17  ;;  %1555 = vmatpush3.bf16.msra.mxu1 %v1677_v21  ;;  %v343_v17 = vpack.c.bf16 %v1721_v15, %v1721_v15 }
  0x66   :  { %1556 = vmatprep.subr.bf16.mxu1 %v1916_v0 }
  0x68   :  { %1443 = vmatpush3.bf16.msra.mxu0 %v1672_v19 }
  0x69   :  { %1444 = vmatprep.subr.bf16.mxu0 %v1673_v20  ;;  %1557 = vmatpush3.bf16.msra.mxu1 %v1680_v24  ;;  %v1725_v24 = vld [vmem:[#allocation8 + $0x30] sm:$0xff]  }
  0x6a   :  { %1558 = vmatprep.subr.bf16.mxu1 %v1916_v0 }
  0x6c   :  { %1445 = vmatpush3.bf16.msra.mxu0 %v1675_v22 }
  0x6d   :  { %1446 = vmatprep.subr.bf16.mxu0 %v1676_v23  ;;  %1559 = vmatpush3.bf16.msra.mxu1 %v1686_v33  ;;  %v1724_v23 = vld [vmem:[#allocation8 + $0x38] sm:$0xff]  }
  0x6e   :  { %1456 = vmatprep.subr.bf16.mxu1 %v1688_v35  ;;  %v1731_v35 = vld [vmem:[#allocation8] sm:$0xff]  }
  0x70   :  { %1447 = vmatpush3.bf16.msra.mxu0 %v1678_v25  ;;  %v1726_v25 = vld [vmem:[#allocation8 + $0x28] sm:$0xff]  }
  0x71   :  { %1448 = vmatprep.subr.bf16.mxu0 %v1679_v26  ;;  %v1727_v26 = vld [vmem:[#allocation8 + $0x20] sm:$0xff]  }
  0x74   :  { %1449 = vmatpush3.bf16.msra.mxu0 %v1681_v27  ;;  %v1728_v27 = vld [vmem:[#allocation8 + $0x18] sm:$0xff]  }
  0x75   :  { %1478 = vmatprep.subr.bf16.mxu0 %v1685_v31  ;;  %v1729_v31 = vld [vmem:[#allocation8 + $0x10] sm:$0xff]  }
  0x77   :  { %771 = vmatmul.mubr.bf16.vlgmr.msra.gmra.mxu0 %v341_v32 }
  0x78   :  { %1479 = vmatpush3.bf16.msra.mxu0 %v1687_v34  ;;  %850 = vmatprep.mubr.bf16.mxu0 %v346_v52  ;;  %v1730_v34 = vld [vmem:[#allocation8 + $0x8] sm:$0xff]  }
  0x79   :  { %1480 = vmatprep.subr.bf16.mxu0 %v1689_v36  ;;  %v1740_v36 = vld [vmem:[#allocation11 + $0x38] sm:$0xff]  }
  0x7c   :  { %1481 = vmatpush3.bf16.msra.mxu0 %v1691_v37  ;;  %v1741_v37 = vld [vmem:[#allocation11 + $0x30] sm:$0xff]  }
  0x7d   :  { %1482 = vmatprep.subr.bf16.mxu0 %v1693_v38  ;;  %v1742_v38 = vld [vmem:[#allocation11 + $0x28] sm:$0xff]  }
  0x80   :  { %1483 = vmatpush3.bf16.msra.mxu0 %v1695_v39  ;;  %v1743_v39 = vld [vmem:[#allocation11 + $0x20] sm:$0xff]  }
  0x81   :  { %1484 = vmatprep.subr.bf16.mxu0 %v1697_v40  ;;  %v1744_v40 = vld [vmem:[#allocation11 + $0x18] sm:$0xff]  }
  0x84   :  { %1485 = vmatpush3.bf16.msra.mxu0 %v1699_v41  ;;  %v1745_v41 = vld [vmem:[#allocation11 + $0x10] sm:$0xff]  }
  0x85   :  { %1486 = vmatprep.subr.bf16.mxu0 %v1701_v42 }
  0x88   :  { %1487 = vmatpush3.bf16.msra.mxu0 %v1703_v43 }
  0x89   :  { %1488 = vmatprep.subr.bf16.mxu0 %v1705_v44 }
  0x8c   :  { %1489 = vmatpush3.bf16.msra.mxu0 %v1707_v45 }
  0x8d   :  { %1490 = vmatprep.subr.bf16.mxu0 %v1709_v46  ;;  %v1338_v46 = vld [vmem:[%s2168_s7] ss:$0 sm:$0xff] }
  0x90   :  { %1491 = vmatpush3.bf16.msra.mxu0 %v1711_v47 }
  0x91   :  { %1492 = vmatprep.subr.bf16.mxu0 %v1713_v48 }
  0x94   :  { %1493 = vmatpush3.bf16.msra.mxu0 %v1715_v49 }
  0x95   :  { %1584 = vmatprep.subr.bf16.mxu0 %v1916_v0 }
  0x97   :  { %851 = vmatmul.mubr.bf16.vlgmr.msra.gmra.mxu0 %v345_v53 }
  0x98   :  { %1600 = vmatprep.mubr.msk.bf16.mxu0 %vm1917_vm0, %v1916_v0  ;;  %1585 = vmatpush3.bf16.msra.mxu0 %v1740_v36 }
  0x99   :  { %1586 = vmatprep.subr.bf16.mxu0 %v1916_v0 }
  0x9c   :  { %1587 = vmatpush3.bf16.msra.mxu0 %v1741_v37 }
  0x9d   :  { %1588 = vmatprep.subr.bf16.mxu0 %v1916_v0 }
  0xa0   :  { %1589 = vmatpush3.bf16.msra.mxu0 %v1742_v38 }
  0xa1   :  { %1590 = vmatprep.subr.bf16.mxu0 %v1916_v0 }
  0xa4   :  { %1591 = vmatpush3.bf16.msra.mxu0 %v1743_v39 }
  0xa5   :  { %1592 = vmatprep.subr.bf16.mxu0 %v1916_v0 }
  0xa8   :  { %1593 = vmatpush3.bf16.msra.mxu0 %v1744_v40 }
  0xa9   :  { %1594 = vmatprep.subr.bf16.mxu0 %v1916_v0 }
  0xac   :  { %1595 = vmatpush3.bf16.msra.mxu0 %v1745_v41 }
  0xad   :  { %1596 = vmatprep.subr.bf16.mxu0 %v1916_v0 }
 0x117   :  { %v197_v55 = vpop.f32.mrf.mxu0 }
 0x118   :  { %v198_v57 = vadd.f32 %v1325_v54, %v197_v55 }
 0x119   :  { %v1542_v58 = vpop.f32.mrf.mxu0 }
 0x11a   :  { %v203_v59 = vmax.f32 %v198_v57, 0.0  ;;  %v1733_v58 = vld [vmem:[#allocation10 + $0x30] sm:$0xff]  }
 0x11b   :  { %v200_v60 = vpop.f32.mrf.mxu0 }
 0x11c   :  { %v204_v63 = vpack.c.bf16 %v203_v59, %v203_v59  ;;  %v1734_v59 = vld [vmem:[#allocation10 + $0x28] sm:$0xff]   ;;  %v1735_v60 = vld [vmem:[#allocation10 + $0x20] sm:$0xff]  }
 0x11d   :  { %v1543_v2 = vpop.f32.mrf.mxu0 }
 0x11e   :  { %1561 = vmatmul.mubr.bf16.vlgmr.msra.gmra.mxu1 %v204_v63  ;;  %v1329_v63 = vld [vmem:[%s2166_s5] ss:$0 sm:$0xff] }
 0x11f   :  { %1457 = vmatpush3.bf16.msra.mxu1 %v1690_v61  ;;  %810 = vmatprep.mubr.bf16.mxu1 %v344_v62  ;;  %v1736_v61 = vld [vmem:[#allocation10 + $0x18] sm:$0xff]   ;;  %v1737_v62 = vld [vmem:[#allocation10 + $0x10] sm:$0xff]  }
 0x120   :  { %1458 = vmatprep.subr.bf16.mxu1 %v1692_v1  ;;  %v1738_v1 = vld [vmem:[#allocation10 + $0x8] sm:$0xff]  }
 0x123   :  { %1459 = vmatpush3.bf16.msra.mxu1 %v1694_v3  ;;  %v1739_v3 = vld [vmem:[#allocation10] sm:$0xff]  }
 0x124   :  { %1460 = vmatprep.subr.bf16.mxu1 %v1696_v4 }
 0x127   :  { %1461 = vmatpush3.bf16.msra.mxu1 %v1698_v5 }
 0x128   :  { %1462 = vmatprep.subr.bf16.mxu1 %v1700_v6  ;;  %v1746_v6 = vld [vmem:[#allocation11 + $0x8] sm:$0xff]  }
 0x129   :  { %1597 = vmatpush3.bf16.msra.mxu0 %v1746_v6 }
 0x12a   :  { %1598 = vmatprep.subr.bf16.mxu0 %v1916_v0 }
 0x12b   :  { %1463 = vmatpush3.bf16.msra.mxu1 %v1702_v7  ;;  %v1747_v7 = vld [vmem:[#allocation11] sm:$0xff]  }
 0x12c   :  { %1464 = vmatprep.subr.bf16.mxu1 %v1704_v8  ;;  %v1387_v8 = vld [vmem:[%s2170_s9] ss:$0 sm:$0xff] }
 0x12d   :  { %1599 = vmatpush3.bf16.msra.mxu0 %v1747_v7 }
 0x12e   :  { %1624 = vmatprep.subr.bf16.mxu0 %v1916_v0 }
 0x12f   :  { %1465 = vmatpush3.bf16.msra.mxu1 %v1706_v9 }
 0x130   :  { %1466 = vmatprep.subr.bf16.mxu1 %v1708_v10 }
 0x133   :  { %1467 = vmatpush3.bf16.msra.mxu1 %v1710_v11 }
 0x134   :  { %1468 = vmatprep.subr.bf16.mxu1 %v1712_v12 }
 0x137   :  { %1469 = vmatpush3.bf16.msra.mxu1 %v1714_v13  ;;  %v1450_v18 = vpop.f32.mrf.mxu0 }
 0x138   :  { %1470 = vmatprep.subr.bf16.mxu1 %v1719_v14  ;;  %v1748_v14 = vld [vmem:[%s2174_s13 + $0x38] sm:$0xff]  }
 0x139   :  { %v1451_v19 = vpop.f32.mrf.mxu0 }
 0x13a   :  { %v1452_v20 = vadd.f32 %v1451_v19, %v1450_v18  ;;  %v1750_v18 = vld [vmem:[%s2174_s13 + $0x28] sm:$0xff]   ;;  %v1751_v19 = vld [vmem:[%s2174_s13 + $0x20] sm:$0xff]  }
 0x13b   :  { %1471 = vmatpush3.bf16.msra.mxu1 %v1720_v16  ;;  %v1453_v21 = vpop.f32.mrf.mxu0 }
 0x13c   :  { %1564 = vmatprep.subr.bf16.mxu1 %v1916_v0  ;;  %v773_v49 = vadd.f32 %v1452_v20, %v1338_v46  ;;  %v1752_v20 = vld [vmem:[%s2174_s13 + $0x18] sm:$0xff]   ;;  %v1753_v21 = vld [vmem:[%s2174_s13 + $0x10] sm:$0xff]  }
 0x13d   :  { %v1454_v22 = vpop.f32.mrf.mxu0 }
 0x13e   :  { %811 = vmatmul.mubr.bf16.vlgmr.msra.gmra.mxu1 %v343_v17  ;;  %v1749_v17 = vld [vmem:[%s2174_s13 + $0x30] sm:$0xff]  }
 0x13f   :  { %1580 = vmatprep.mubr.msk.bf16.mxu1 %vm1917_vm0, %v1916_v0  ;;  %1565 = vmatpush3.bf16.msra.mxu1 %v1724_v23 }
 0x140   :  { %1566 = vmatprep.subr.bf16.mxu1 %v1916_v0 }
 0x143   :  { %1567 = vmatpush3.bf16.msra.mxu1 %v1725_v24 }
 0x144   :  { %1568 = vmatprep.subr.bf16.mxu1 %v1916_v0 }
 0x147   :  { %1569 = vmatpush3.bf16.msra.mxu1 %v1726_v25 }
 0x148   :  { %1570 = vmatprep.subr.bf16.mxu1 %v1916_v0 }
 0x14b   :  { %1571 = vmatpush3.bf16.msra.mxu1 %v1727_v26  ;;  %v1754_v26 = vld [vmem:[%s2174_s13 + $0x8] sm:$0xff]  }
 0x14c   :  { %1572 = vmatprep.subr.bf16.mxu1 %v1916_v0 }
 0x14f   :  { %1573 = vmatpush3.bf16.msra.mxu1 %v1728_v27  ;;  %v1755_v27 = vld [vmem:[%s2174_s13] sm:$0xff]  }
 0x150   :  { %1574 = vmatprep.subr.bf16.mxu1 %v1916_v0 }
 0x153   :  { %1575 = vmatpush3.bf16.msra.mxu1 %v1729_v31 }
 0x154   :  { %1576 = vmatprep.subr.bf16.mxu1 %v1916_v0 }
 0x157   :  { %v1494_v28 = vpop.f32.mrf.mxu0  ;;  %1577 = vmatpush3.bf16.msra.mxu1 %v1730_v34 }
 0x158   :  { %1578 = vmatprep.subr.bf16.mxu1 %v1916_v0 }
 0x159   :  { %v1495_v29 = vpop.f32.mrf.mxu0 }
 0x15a   :  { %v1496_v30 = vadd.f32 %v1495_v29, %v1494_v28  ;;  %v1412_v29 = vld [vmem:[%s2173_s12] ss:$0 sm:$0xff] }
 0x15b   :  { %v1497_v32 = vpop.f32.mrf.mxu0  ;;  %1579 = vmatpush3.bf16.msra.mxu1 %v1731_v35 }
 0x15c   :  { %1604 = vmatprep.subr.bf16.mxu1 %v1916_v0 }
 0x15d   :  { %v1498_v33 = vpop.f32.mrf.mxu0 }
 0x1de   :  { %v310_v42 = vpop.f32.mrf.mxu1 }
 0x1df   :  { %v311_v2 = vadd.f32 %v1329_v63, %v310_v42 }
 0x1e0   :  { %v1562_v43 = vpop.f32.mrf.mxu1 }
 0x1e1   :  { %v316_v4 = vmax.f32 %v311_v2, 0.0 }
 0x1e2   :  { %v313_v44 = vpop.f32.mrf.mxu1 }
 0x1e3   :  { %v972_v5 = vpack.c.bf16 %v316_v4, %v316_v4 }
 0x1e4   :  { %v1563_v45 = vpop.f32.mrf.mxu1 }
 0x1fe   :  { %v1472_v47 = vpop.f32.mrf.mxu1 }
 0x200   :  { %v1473_v48 = vpop.f32.mrf.mxu1 }
 0x201   :  { %v1474_v50 = vadd.f32 %v1473_v48, %v1472_v47 }
 0x202   :  { %v1475_v51 = vpop.f32.mrf.mxu1 }
 0x203   :  { %v813_v52 = vadd.f32 %v1474_v50, %v773_v49 }
 0x204   :  { %v1476_v53 = vpop.f32.mrf.mxu1 }
 0x205   :  { %v853_v54 = vadd.f32 %v1496_v30, %v813_v52 }
 0x207   :  { %v858_v55 = vmax.f32 %v853_v54, 0.0 }
 0x209   :  { %v859_v57 = vpack.c.bf16 %v858_v55, %v858_v55 }
 0x20b   :  { %1581 = vmatmul.mubr.bf16.vlgmr.msra.gmra.mxu1 %v859_v57 }
 0x20c   :  { %1605 = vmatpush3.bf16.msra.mxu1 %v1732_v56  ;;  %1620 = vmatprep.mubr.msk.bf16.mxu1 %vm1917_vm0, %v1916_v0 }
 0x20d   :  { %1606 = vmatprep.subr.bf16.mxu1 %v1916_v0 }
 0x210   :  { %1607 = vmatpush3.bf16.msra.mxu1 %v1733_v58 }
 0x211   :  { %1608 = vmatprep.subr.bf16.mxu1 %v1916_v0 }
 0x214   :  { %1609 = vmatpush3.bf16.msra.mxu1 %v1734_v59 }
 0x215   :  { %1610 = vmatprep.subr.bf16.mxu1 %v1916_v0 }
 0x218   :  { %1611 = vmatpush3.bf16.msra.mxu1 %v1735_v60 }
 0x219   :  { %1612 = vmatprep.subr.bf16.mxu1 %v1916_v0 }
 0x21c   :  { %1613 = vmatpush3.bf16.msra.mxu1 %v1736_v61 }
 0x21d   :  { %1614 = vmatprep.subr.bf16.mxu1 %v1916_v0 }
 0x220   :  { %1615 = vmatpush3.bf16.msra.mxu1 %v1737_v62 }
 0x221   :  { %1616 = vmatprep.subr.bf16.mxu1 %v1916_v0 }
 0x224   :  { %1617 = vmatpush3.bf16.msra.mxu1 %v1738_v1 }
 0x225   :  { %1618 = vmatprep.subr.bf16.mxu1 %v1916_v0 }
 0x228   :  { %1619 = vmatpush3.bf16.msra.mxu1 %v1739_v3 }
 0x22b   :  { %1621 = vmatmul.mubr.bf16.vlgmr.msra.gmra.mxu1 %v972_v5 }
 0x2cb   :  { %v965_v9 = vpop.f32.mrf.mxu1 }
 0x2cc   :  { %v966_v10 = vadd.f32 %v1387_v8, %v965_v9 }
 0x2cd   :  { %v1582_v11 = vpop.f32.mrf.mxu1 }
 0x2ce   :  { %v971_v12 = vmax.f32 %v966_v10, 0.0 }
 0x2cf   :  { %v968_v13 = vpop.f32.mrf.mxu1 }
 0x2d0   :  { %v989_v15 = vpack.c.bf16 %v971_v12, %v971_v12 }
 0x2d1   :  { %v1583_v16 = vpop.f32.mrf.mxu1 }
 0x2d2   :  { %1601 = vmatmul.mubr.bf16.vlgmr.msra.gmra.mxu0 %v989_v15 }
 0x2d3   :  { %1625 = vmatpush3.bf16.msra.mxu0 %v1748_v14  ;;  %1640 = vmatprep.mubr.msk.bf16.mxu0 %vm1917_vm0, %v1916_v0 }
 0x2d4   :  { %1626 = vmatprep.subr.bf16.mxu0 %v1916_v0 }
 0x2d7   :  { %1627 = vmatpush3.bf16.msra.mxu0 %v1749_v17 }
 0x2d8   :  { %1628 = vmatprep.subr.bf16.mxu0 %v1916_v0 }
 0x2db   :  { %1629 = vmatpush3.bf16.msra.mxu0 %v1750_v18 }
 0x2dc   :  { %1630 = vmatprep.subr.bf16.mxu0 %v1916_v0 }
 0x2df   :  { %1631 = vmatpush3.bf16.msra.mxu0 %v1751_v19 }
 0x2e0   :  { %1632 = vmatprep.subr.bf16.mxu0 %v1916_v0 }
 0x2e3   :  { %1633 = vmatpush3.bf16.msra.mxu0 %v1752_v20 }
 0x2e4   :  { %1634 = vmatprep.subr.bf16.mxu0 %v1916_v0 }
 0x2e7   :  { %1635 = vmatpush3.bf16.msra.mxu0 %v1753_v21 }
 0x2e8   :  { %1636 = vmatprep.subr.bf16.mxu0 %v1916_v0 }
 0x2eb   :  { %v1176_v22 = vpop.f32.mrf.mxu1  ;;  %1637 = vmatpush3.bf16.msra.mxu0 %v1754_v26 }
 0x2ec   :  { %1638 = vmatprep.subr.bf16.mxu0 %v1916_v0  ;;  %v1413_v0 = vld [vmem:[%s2175_s14] ss:$0 sm:$0xff] }
 0x2ed   :  { %v1622_v23 = vpop.f32.mrf.mxu1 }
 0x2ef   :  { %v1179_v24 = vpop.f32.mrf.mxu1  ;;  %1639 = vmatpush3.bf16.msra.mxu0 %v1755_v27 }
 0x2f1   :  { %v1623_v25 = vpop.f32.mrf.mxu1 }
 0x392   :  { %v1088_v28 = vpop.f32.mrf.mxu0 }
 0x393   :  { %v1177_v30 = vadd.f32 %v1176_v22, %v1088_v28 }
 0x394   :  { %v1602_v31 = vpop.f32.mrf.mxu0 }
 0x395   :  { %v1189_v32 = vadd.f32 %v1412_v29, %v1177_v30 }
 0x396   :  { %v1091_v33 = vpop.f32.mrf.mxu0 }
 0x397   :  { %v1190_v34 = vmax.f32 %v1189_v32, 0.0 }
 0x398   :  { %v1603_v35 = vpop.f32.mrf.mxu0 }
 0x399   :  { %v1191_v36 = vpack.c.bf16 %v1190_v34, %v1190_v34 }
 0x39b   :  { %1641 = vmatmul.mubr.bf16.vlgmr.msra.gmra.mxu0 %v1191_v36 }
 0x45b   :  { %v1297_v37 = vpop.f32.mrf.mxu0 }
 0x45c   :  { %v1298_v38 = vadd.f32 %v1413_v0, %v1297_v37 }
 0x45d   :  { %v1642_v39 = vpop.f32.mrf.mxu0 }
 0x45e   :  { %1304 = vst.msk [vmem:[#allocation13] sm:$0xff] %vm1303_vm2, %v1298_v38 }
 0x45f   :  { %v1300_v40 = vpop.f32.mrf.mxu0 }
 0x461   :  { %v1643_v41 = vpop.f32.mrf.mxu0 }
 0x462   :  { %1309 = vsyncadd [#allocation4], 64  ;;  %s1918_s12 = smov [#allocation13]  }
 0x463   :  { %s1310_s13 = sshll.u32 %s1918_s12, 4  ;;  %s1311_s13 = int_to_ptr.vmem [resolvable:$true] %s1310_s13 }
 0x464   :  { %s1876_s19 = scalar_lea.vmem %s1311_s13, 64  ;;  %s1880_s7 = scalar_lea.vmem %s1311_s13, 128 }
 0x465   :  { %p1877_p2 = scmp.ne.s32.totalorder %s1311_s13, %s1876_s19  ;;  %p1881_p3 = scmp.lt.s32.totalorder %s1311_s13, %s1311_s13 }
 0x466   :  { %p1882_p4 = scmp.lt.s32.totalorder %s1880_s7, %s1876_s19 }
 0x468   :  { %p1883_p5 = por %p1882_p4, %p1881_p3 }
 0x46a   :  { %p1884_p6 = pnand %p1883_p5, %p1877_p2 }
 0x46c   :  { %1887 = shalt.err (!%p1884_p6)
}
 0x46d   :  { %1316 = dma.vmem_to_hbm [thread:$0]  %s1311_s13, 64, %s2176_s15, [#allocation4], %s1907_s21, %s1907_s21, %s1908_s22  }
 0x46e   :  { %1904 = dma.done.wait [#allocation4], 128  }
 0x46f   :  { %1905 = vsyncadd [#allocation4], 4294967168 }
 0x470   :  { %1320 = vsyncpa [#allocation3], 1 }
 0x471   :  { %1321 = vsyncpa [#allocation6], 1 }
 0x472   :  { %1322 = vsyncpa [#allocation9], 1 }
 0x473   :  { %1323 = vsyncpa [#allocation12], 1 }
 0x474   :  { %1324 = vsyncpa [#allocation4], 1 }

</bundles_post_ra>
